<compile_context>
chip_gen: v6e
topology: v6e:2x2x1
jax: 0.10.0
libtpu: 0.0.40
codegen_flags: <defaults>
</compile_context>

<pallas_src>
import math

import jax
import jax.numpy as jnp
from jax.experimental import pallas as pl
from jax.experimental.pallas import tpu as pltpu


def _round_up(x: int, m: int) -> int:
    return ((x + m - 1) // m) * m


def _make_general_kernel(prefactor: float, n_features: int):
    """Arbitrary weights: one sin per (feature, edge)."""
    def kernel(w_ref, d_ref, o_ref):
        # w_ref: (F_pad, 1)  weights pre-scaled by 1/r_max (F_pad = roundup(F, 8))
        # d_ref: (1, TN)     distances tile, edges on the lane axis
        # o_ref: (TN, F)     output tile already in the module's [N, F] layout
        d = d_ref[...]                       # (1, TN)
        w = w_ref[...]                       # (F_pad, 1)
        scale = prefactor / d                # one exact divide per edge column
        vals = jnp.sin(w * d) * scale        # (F_pad, TN) lane-dense compute
        # In-kernel transpose (XLU has slack; compute is VPU/EUP-bound):
        o_ref[...] = vals.T[:, :n_features]  # (TN, F) store, no wrapper pass
    return kernel


def _make_harmonic_kernel(prefactor: float, n_features: int, n_groups: int):
    """Fast path: requires bessel_weights[k-1] == k * bessel_weights[0] (module init: k*pi)."""
    def kernel(w8_ref, d_ref, o_ref):
        # w8_ref: (8, 1)  first 8 weights, pre-scaled by 1/r_max
        # d_ref:  (1, TN)
        # o_ref:  (TN, F)
        d = d_ref[...]                       # (1, TN)
        w8 = w8_ref[...]                     # (8, 1)
        scale = prefactor / d                # (1, TN)
        args = w8 * d                        # (8, TN): arguments for k = 1..8
        bs = jnp.sin(args)                   # (8, TN)  one sin block
        bc = jnp.cos(args)                   # (8, TN)  one cos block
        s8 = bs[7:8, :]                      # (1, TN) = sin(w_8 * d) sublane broadcast
        c8 = bc[7:8, :]                      # (1, TN) = cos(w_8 * d)
        groups = [bs]
        gs, gc = s8, c8                      # sin/cos(j * w_8 * d) for j = 1
        for j in range(1, n_groups):
            # sin(w_r d + j w_8 d) = sin(w_r d) cos(j w_8 d) + cos(w_r d) sin(j w_8 d)
            groups.append(bs * gc + bc * gs)             # cheap VALU FMAs
            if j + 1 < n_groups:
                gs, gc = gs * c8 + gc * s8, gc * c8 - gs * s8
        vals = jnp.concatenate(groups, axis=0) * scale   # (8*n_groups, TN)
        o_ref[...] = vals.T[:, :n_features]              # XLU transpose -> [TN, F]
    return kernel


def bessel_rbf(distances: jax.Array,
               bessel_weights: jax.Array,
               r_max: float,
               *,
               tile_n: int = 8192,
               assume_harmonic_weights: bool = False) -> jax.Array:
    """distances: [N, 1] f32; bessel_weights: [F] f32 -> [N, F] f32."""
    n = distances.shape[0]
    f = bessel_weights.shape[0]
    assert distances.shape == (n, 1)
    assert n >= 1 and f >= 1
    assert tile_n % 128 == 0 and tile_n >= 128

    prefactor = float(2.0 / r_max)

    # --- tile selection --------------------------------------------------
    eff_tile = min(tile_n, _round_up(n, 128))
    # v7x megacore: a single-step grid leaves one TensorCore idle; split big
    # single-tile problems into two "parallel" steps (no effect on v5e/v6e).
    if _round_up(n, eff_tile) // eff_tile == 1 and eff_tile > 1024:
        eff_tile = _round_up(eff_tile // 2, 128)
    n_pad = _round_up(n, eff_tile)
    grid = n_pad // eff_tile

    # --- parameter / input prep (hoisted off the hot path) ----------------
    w_scaled = bessel_weights.astype(jnp.float32) / jnp.float32(r_max)
    d_row = distances.astype(jnp.float32).reshape(1, n)
    if n_pad != n:
        # Pad value 1.0 keeps the padded divide finite; those rows are
        # boundary-clipped on the output store anyway.
        d_row = jnp.pad(d_row, ((0, 0), (0, n_pad - n)), constant_values=1.0)

    use_harmonic = assume_harmonic_weights and f > 8
    if use_harmonic:
        n_groups = (f + 7) // 8
        w_in = w_scaled[:8].reshape(8, 1)
        kernel = _make_harmonic_kernel(prefactor, f, n_groups)
        transc_per_edge = 16                      # 8 sin + 8 cos
    else:
        f_pad = _round_up(f, 8)
        w_in = jnp.pad(w_scaled, (0, f_pad - f)).reshape(f_pad, 1)
        kernel = _make_general_kernel(prefactor, f)
        transc_per_edge = f
    w_rows = w_in.shape[0]

    out = pl.pallas_call(
        kernel,
        out_shape=jax.ShapeDtypeStruct((n, f), jnp.float32),
        grid_spec=pltpu.PrefetchScalarGridSpec(
            num_scalar_prefetch=0,
            grid=(grid,),
            in_specs=[
                pl.BlockSpec((w_rows, 1), lambda i: (0, 0)),       # weights (constant block)
                pl.BlockSpec((1, eff_tile), lambda i: (0, i)),     # distances tile
            ],
            # Output written directly in [N, F]; the last block is clipped.
            out_specs=pl.BlockSpec((eff_tile, f), lambda i: (i, 0)),
        ),
        compiler_params=pltpu.CompilerParams(
            dimension_semantics=("parallel",)),
        cost_estimate=pl.CostEstimate(
            flops=6 * n_pad * f,
            transcendentals=n_pad * transc_per_edge,
            bytes_accessed=4 * (n * f + n_pad + f)),
    )(w_in, d_row)
    return out


def bessel_rbf_reference(distances, bessel_weights, r_max):
    prefactor = 2.0 / r_max
    numerator = jnp.sin(bessel_weights[None, :] * distances / r_max)
    return prefactor * (numerator / distances)


if __name__ == "__main__":
    n_features = 20
    max_distance = 5.0
    n_edges = 64  # number of distances (e.g. edges in a graph)

    # Deterministic parameter init, exactly as in the module's __init__:
    # linspace(1, n_features, n_features) * pi  (harmonic: w_k = k*pi)
    bessel_weights = jnp.linspace(1.0, float(n_features), n_features,
                                  dtype=jnp.float32) * math.pi

    # Deterministic example input: strictly positive distances (the module,
    # like the PyTorch reference, divides by the raw distances).
    key = jax.random.PRNGKey(0)
    distances = jax.random.uniform(
        key, (n_edges, 1), dtype=jnp.float32,
        minval=0.1, maxval=max_distance)

    ref = bessel_rbf_reference(distances, bessel_weights, max_distance)

    # Fast path: valid for the module's init (and non-trainable) weights.
    out = bessel_rbf(distances, bessel_weights, max_distance,
                     assume_harmonic_weights=True)
    out = jax.block_until_ready(out)
    assert out.shape == (n_edges, n_features)
    assert bool(jnp.allclose(out, ref, rtol=1e-4, atol=1e-4)), \
        "harmonic path mismatch vs reference"

    # General path: arbitrary / trained weights, no harmonic assumption.
    out_g = jax.block_until_ready(
        bessel_rbf(distances, bessel_weights, max_distance,
                   assume_harmonic_weights=False))
    assert bool(jnp.allclose(out_g, ref, rtol=1e-4, atol=1e-4)), \
        "general path mismatch vs reference"

    # Ragged edge count exercises the boundary-clipped last output block.
    n_odd = 57
    d_odd = distances[:n_odd]
    ref_odd = bessel_rbf_reference(d_odd, bessel_weights, max_distance)
    out_odd = jax.block_until_ready(
        bessel_rbf(d_odd, bessel_weights, max_distance,
                   assume_harmonic_weights=True))
    assert out_odd.shape == (n_odd, n_features)
    assert bool(jnp.allclose(out_odd, ref_odd, rtol=1e-4, atol=1e-4)), \
        "ragged-N mismatch vs reference"

    print("KERNEL_OK")
</pallas_src>

<mosaic_0001>
module attributes {stable_mosaic.version = 11 : i64} {
  func.func @kernel(%arg0: i32, %arg1: memref<8x1xf32, #tpu.memory_space<vmem>>, %arg2: memref<1x128xf32, #tpu.memory_space<vmem>>, %arg3: memref<128x20xf32, #tpu.memory_space<vmem>>) attributes {dimension_semantics = [#tpu.dimension_semantics<parallel>], iteration_bounds = array<i64: 1>, scalar_prefetch = 0 : i64, scratch_operands = 0 : i64, tpu.core_type = #tpu.core_type<tc>, window_params = [{pipeline_mode = #tpu.pipeline_mode<synchronous>, transform_indices = @transform_0, window_bounds = array<i64: 8, 1>}, {transform_indices = @transform_1, window_bounds = array<i64: 1, 128>}, {transform_indices = @transform_2, window_bounds = array<i64: 128, 20>}]} {
    %c0 = arith.constant 0 : index
    %c0_0 = arith.constant 0 : index
    %0 = vector.load %arg2[%c0, %c0_0] : memref<1x128xf32, #tpu.memory_space<vmem>>, vector<1x128xf32>
    %c0_1 = arith.constant 0 : index
    %c0_2 = arith.constant 0 : index
    %1 = vector.load %arg1[%c0_1, %c0_2] : memref<8x1xf32, #tpu.memory_space<vmem>>, vector<8x1xf32>
    %cst = arith.constant 4.000000e-01 : f32
    %2 = vector.broadcast %cst : f32 to vector<1x128xf32>
    %3 = arith.divf %2, %0 : vector<1x128xf32>
    %4 = vector.broadcast %1 : vector<8x1xf32> to vector<8x128xf32>
    %5 = vector.broadcast %0 : vector<1x128xf32> to vector<8x128xf32>
    %6 = arith.mulf %4, %5 : vector<8x128xf32>
    %7 = math.sin %6 : vector<8x128xf32>
    %8 = math.cos %6 : vector<8x128xf32>
    %9 = vector.extract_strided_slice %7 {offsets = [7, 0], sizes = [1, 128], strides = [1, 1]} : vector<8x128xf32> to vector<1x128xf32>
    %10 = vector.extract_strided_slice %8 {offsets = [7, 0], sizes = [1, 128], strides = [1, 1]} : vector<8x128xf32> to vector<1x128xf32>
    %11 = vector.broadcast %10 : vector<1x128xf32> to vector<8x128xf32>
    %12 = arith.mulf %7, %11 : vector<8x128xf32>
    %13 = vector.broadcast %9 : vector<1x128xf32> to vector<8x128xf32>
    %14 = arith.mulf %8, %13 : vector<8x128xf32>
    %15 = arith.addf %12, %14 : vector<8x128xf32>
    %16 = arith.mulf %9, %10 : vector<1x128xf32>
    %17 = arith.mulf %10, %9 : vector<1x128xf32>
    %18 = arith.addf %16, %17 : vector<1x128xf32>
    %19 = arith.mulf %10, %10 : vector<1x128xf32>
    %20 = arith.mulf %9, %9 : vector<1x128xf32>
    %21 = arith.subf %19, %20 : vector<1x128xf32>
    %22 = vector.broadcast %21 : vector<1x128xf32> to vector<8x128xf32>
    %23 = arith.mulf %7, %22 : vector<8x128xf32>
    %24 = vector.broadcast %18 : vector<1x128xf32> to vector<8x128xf32>
    %25 = arith.mulf %8, %24 : vector<8x128xf32>
    %26 = arith.addf %23, %25 : vector<8x128xf32>
    %27 = tpu.concatenate %7, %15, %26 in 0 : vector<8x128xf32>, vector<8x128xf32>, vector<8x128xf32> -> vector<24x128xf32>
    %28 = vector.broadcast %3 : vector<1x128xf32> to vector<24x128xf32>
    %29 = arith.mulf %27, %28 : vector<24x128xf32>
    %30 = tpu.transpose %29, [1, 0] : vector<24x128xf32> -> vector<128x24xf32>
    %31 = vector.extract_strided_slice %30 {offsets = [0, 0], sizes = [128, 20], strides = [1, 1]} : vector<128x24xf32> to vector<128x20xf32>
    %c0_3 = arith.constant 0 : index
    %c0_4 = arith.constant 0 : index
    %32 = vector.load %arg3[%c0_3, %c0_4] : memref<128x20xf32, #tpu.memory_space<vmem>>, vector<128x20xf32>
    tpu.vector_store %arg3[%c0_3, %c0_4], %31 {strides = array<i32>} : memref<128x20xf32, #tpu.memory_space<vmem>>, vector<128x20xf32>,
    return
  }
  func.func @transform_0(%arg0: i32) -> (i32, i32) {
    %c0_i32 = arith.constant 0 : i32
    %c0_i32_0 = arith.constant 0 : i32
    %c0_i32_1 = arith.constant 0 : i32
    return %c0_i32, %c0_i32_0 : i32, i32
  }
  func.func @transform_1(%arg0: i32) -> (i32, i32) {
    %c0_i32 = arith.constant 0 : i32
    %c0_i32_0 = arith.constant 0 : i32
    return %c0_i32, %arg0 : i32, i32
  }
  func.func @transform_2(%arg0: i32) -> (i32, i32) {
    %c0_i32 = arith.constant 0 : i32
    %c0_i32_0 = arith.constant 0 : i32
    return %arg0, %c0_i32 : i32, i32
  }
}

</mosaic_0001>

<bundles_post_ra>
// kernel: tpu_custom_call.1
= control target key start
LH: loop header
LB: loop body
LE: loop exit
PB: predicated region body
PF: predicated region fallthrough
CT: control target
= control target key end

     0   :  { %v415_v1 = vmov 0   ;;  %v21_v2 = vlaneseq  ;;  %v416_v19 = vmov 683565275   ;;  %v417_v21 = vmov 2475754826   ;;  %s508_s0 = inlined_call_operand.vmem [shape: f32[8,1], index: 0, kind: input, shape index: {}]   ;;  %s509_s1 = inlined_call_operand.vmem [shape: f32[1,128], index: 1, kind: input, shape index: {}]   ;;  %s510_s2 = inlined_call_operand.vmem [shape: f32[64,20], index: 2, kind: output, shape index: {}]  }
   0x1   :  { %v12_v0 = vld [vmem:[%s508_s0] sm:$0xff]  ;;  %408 = vset.pattern.permute.xlu0 %v415_v1  ;;  %v418_v24 = vmov 2131351028   ;;  %v419_v27 = vmov 2102212464  }
   0x2   :  { %17 = vperm.xlu0 %408, %v12_v0   ;;  %v440_v3 = vshrl.u32 %v21_v2, 7  ;;  %v446_v5 = vld [vmem:[%s509_s1] sm:$0x1]  ;;  %v420_v30 = vmov 920167782  }
   0x3   :  { %v421_v33 = vmov 1326507024   ;;  %409 = vrcp.f32 %v446_v5 }
   0x4   :  { %v23_v4 = vsub.s32 0, %v440_v3 }
   0x6   :  { %v24_v6 = vrot.slane %v446_v5, %v23_v4 }
  0x7d   :  { %v18_v7 = vpop.permute.xlu0 %17 }
  0x7e   :  { %v451_v8 = vmul.f32 %v24_v6, %v18_v7 }
  0x80   :  { %v30_v9 = vand.u32 2139095040, %v451_v8  ;;  %v27_v13 = vand.u32 2147483647, %v451_v8  ;;  %vm29_vm7 = vcmp.lt.s32.totalorder %v451_v8, 0  ;;  %vm119_vm15 = vweird.f32 %v451_v8 }
  0x82   :  { %v31_v10 = vshrl.u32 %v30_v9, 23  ;;  %v34_v16 = vand.u32 8388607, %v27_v13  ;;  %vm28_vm8 = vcmp.le.f32.partialorder %v27_v13, 0.7853982 }
  0x84   :  { %v388_v11 = vadd.s32 4294967169, %v31_v10  ;;  %v35_v35 = vor.u32 8388608, %v34_v16 }
  0x86   :  { %v37_v12 = vadd.s32 1, %v388_v11  ;;  %v75_v49 = vshll.u32 %v35_v35, 8 }
  0x88   :  { %vm38_vm0 = vcmp.gt.s32.totalorder %v37_v12, 0 }
  0x89   :  { %v39_v14 = vsel %vm38_vm0, %v37_v12, 0  ;;  %vm302_vm0 = vcmask 162816  }
  0x8a   :  { %v41_v15 = vand.u32 31, %v39_v14  ;;  %v40_v18 = vshrl.u32 %v39_v14, 5 }
  0x8c   :  { %v42_v17 = vsub.s32 32, %v41_v15  ;;  %v44_v20 = vshll.u32 %v416_v19, %v41_v15  ;;  %v47_v22 = vshll.u32 %v417_v21, %v41_v15  ;;  %v50_v26 = vshll.u32 %v418_v24, %v41_v15 }
  0x8d   :  { %v53_v29 = vshll.u32 %v419_v27, %v41_v15  ;;  %v56_v32 = vshll.u32 %v420_v30, %v41_v15  ;;  %vm59_vm1 = vcmp.lt.s32.totalorder %v40_v18, 1  ;;  %vm62_vm2 = vcmp.lt.s32.totalorder %v40_v18, 4 }
  0x8e   :  { %v45_v23 = vshrl.u32 %v417_v21, %v42_v17  ;;  %v48_v25 = vshrl.u32 %v418_v24, %v42_v17  ;;  %v51_v28 = vshrl.u32 %v419_v27, %v42_v17  ;;  %v54_v31 = vshrl.u32 %v420_v30, %v42_v17 }
  0x8f   :  { %v57_v34 = vshrl.u32 %v421_v33, %v42_v17  ;;  %v43_v44 = vshrl.u32 %v416_v19, %v42_v17  ;;  %vm61_vm3 = vcmp.lt.s32.totalorder %v40_v18, 3  ;;  %vm60_vm4 = vcmp.lt.s32.totalorder %v40_v18, 2 }
  0x90   :  { %v46_v36 = vor.u32 %v45_v23, %v44_v20  ;;  %v49_v37 = vor.u32 %v48_v25, %v47_v22  ;;  %v52_v38 = vor.u32 %v51_v28, %v50_v26  ;;  %v55_v39 = vor.u32 %v54_v31, %v53_v29 }
  0x91   :  { %v58_v40 = vor.u32 %v57_v34, %v56_v32  ;;  %v410_v32 = vpop.eup %409 }
  0x92   :  { %v64_v41 = vsel %vm62_vm2, %v52_v38, 2102212464  ;;  %v67_v42 = vsel %vm59_vm1, %v46_v36, %v49_v37  ;;  %v71_v43 = vsel %vm59_vm1, %v49_v37, %v52_v38  ;;  %v68_v45 = vsel %vm62_vm2, %v55_v39, 920167782 }
  0x93   :  { %v72_v46 = vsel %vm62_vm2, %v58_v40, 1326507024  ;;  %v69_v47 = vsel %vm61_vm3, %v52_v38, %v68_v45  ;;  %v63_v50 = vsel %vm59_vm1, %v43_v44, %v46_v36  ;;  %v65_v51 = vsel %vm61_vm3, %v49_v37, %v64_v41 }
  0x94   :  { %v73_v48 = vsel %vm61_vm3, %v55_v39, %v72_v46  ;;  %v70_v52 = vsel %vm60_vm4, %v67_v42, %v69_v47  ;;  %v66_v58 = vsel %vm60_vm4, %v63_v50, %v65_v51  ;;  %v14_v33 = vmul.f32 0.4, %v410_v32 }
  0x95   :  { %v74_v53 = vsel %vm60_vm4, %v71_v43, %v73_v48  ;;  %v460_v56 = vmul.u32.u64.low %v75_v49, %v70_v52  ;;  %v461_v57 = vmul.u32.u64.high %v75_v49, %v70_v52, %v460_v56  ;;  %v82_v60 = vmul.u32 %v75_v49, %v66_v58 }
  0x96   :  { %v457_v54 = vmul.u32.u64.low %v75_v49, %v74_v53  ;;  %v458_v55 = vmul.u32.u64.high %v75_v49, %v74_v53, %v457_v54  ;;  %v236_v37 = vsub.s32 7, %v440_v3  ;;  %v265_v13 = vrot.slane %v14_v33, %v23_v4 }
  0x97   :  { %v85_v59 = vadd.s32 1, %v461_v57 }
  0x98   :  { %vm84_vm5 = vc.u32 %v458_v55, %v460_v56  ;;  %v83_v12 = vadd.s32 %v460_v56, %v458_v55 }
  0x99   :  { %v86_v61 = vsel %vm84_vm5, %v85_v59, %v461_v57 }
  0x9a   :  { %v87_v62 = vadd.s32 %v86_v61, %v82_v60 }
  0x9c   :  { %v88_v63 = vadd.s32 536870912, %v87_v62 }
  0x9e   :  { %v89_v0 = vshrl.u32 %v88_v63, 30 }
  0xa0   :  { %v90_v1 = vshll.u32 %v89_v0, 30  ;;  %v113_v26 = vsub.s32 4, %v89_v0 }
  0xa2   :  { %v91_v2 = vsub.s32 %v87_v62, %v90_v1  ;;  %v114_v29 = vsel %vm29_vm7, %v113_v26, %v89_v0 }
  0xa3   :  { %v116_v30 = vsel %vm28_vm8, 0, %v114_v29 }
  0xa4   :  { %v93_v6 = vsub.s32 0, %v91_v2  ;;  %v120_v31 = vadd.s32 3, %v116_v30  ;;  %v224_v35 = vand.u32 3, %v116_v30 }
  0xa6   :  { %v389_v7 = vmin.u32 %v93_v6, %v91_v2  ;;  %v121_v34 = vand.u32 3, %v120_v31  ;;  %vm229_vm9 = vcmp.eq.s32.totalorder %v224_v35, 2  ;;  %vm226_vm11 = vcmp.eq.s32.totalorder %v224_v35, 0 }
  0xa7   :  { %vm225_vm13 = vcmp.lt.s32.totalorder %v224_v35, 2 }
  0xa8   :  { %v95_v9 = vclz %v389_v7  ;;  %vm126_vm10 = vcmp.eq.s32.totalorder %v121_v34, 2  ;;  %vm123_vm12 = vcmp.eq.s32.totalorder %v121_v34, 0  ;;  %vm122_vm14 = vcmp.lt.s32.totalorder %v121_v34, 2 }
  0xaa   :  { %v390_v10 = vadd.s32 4294967294, %v95_v9 }
  0xac   :  { %vm391_vm6 = vcmp.lt.s32.totalorder %v390_v10, 0 }
  0xad   :  { %v98_v11 = vsel %vm391_vm6, 0, %v390_v10 }
  0xae   :  { %v99_v14 = vsub.s32 32, %v98_v11  ;;  %v103_v15 = vsub.s32 4294967266, %v98_v11  ;;  %v100_v16 = vshll.u32 %v91_v2, %v98_v11 }
  0xb0   :  { %v101_v17 = vshrl.u32 %v83_v12, %v99_v14  ;;  %v104_v18 = vadd.s32 127, %v103_v15 }
  0xb2   :  { %v102_v19 = vor.u32 %v101_v17, %v100_v16  ;;  %v105_v20 = vshll.u32 %v104_v18, 23 }
  0xb4   :  { %v106_v21 = vor.u32 4788187, %v105_v20  ;;  %v109_v23 = vcvt.s32.f32 %v102_v19 }
  0xb6   :  { %v107_v22 = vand.u32 2147483647, %v106_v21 }
  0xb8   :  { %v110_v24 = vmul.f32 %v109_v23, %v107_v22 }
  0xba   :  { %v111_v25 = vxor.u32 2147483648, %v110_v24 }
  0xbc   :  { %v112_v27 = vsel %vm29_vm7, %v111_v25, %v110_v24 }
  0xbd   :  { %v115_v28 = vsel %vm28_vm8, %v451_v8, %v112_v27 }
  0xbe   :  { %411 = vcosq.f32 %v115_v28 }
  0xbf   :  { %413 = vsinq.f32 %v115_v28 }
  0xcb   :  { %v412_v5 = vpop.eup %411 }
  0xcc   :  { %v414_v36 = vpop.eup %413  ;;  %v127_v38 = vxor.u32 2147483648, %v412_v5 }
  0xcd   :  { %v124_v39 = vxor.u32 2147483648, %v414_v36 }
  0xce   :  { %v231_v40 = vsel %vm229_vm9, %v127_v38, %v414_v36  ;;  %v128_v41 = vsel %vm126_vm10, %v127_v38, %v414_v36 }
  0xcf   :  { %v228_v42 = vsel %vm226_vm11, %v412_v5, %v124_v39  ;;  %v125_v43 = vsel %vm123_vm12, %v412_v5, %v124_v39 }
  0xd0   :  { %v232_v44 = vsel %vm225_vm13, %v228_v42, %v231_v40  ;;  %v129_v45 = vsel %vm122_vm14, %v125_v43, %v128_v41 }
  0xd1   :  { %v233_v46 = vsel %vm119_vm15, nan, %v232_v44  ;;  %v130_v47 = vsel %vm119_vm15, nan, %v129_v45 }
  0xd2   :  { %v267_v48 = vmul.f32 %v265_v13, %v130_v47  ;;  %v237_v49 = vrot.slane %v233_v46, %v236_v37  ;;  %v242_v50 = vrot.slane %v130_v47, %v236_v37  ;;  %v245_v3 = vmul.f32 %v233_v46, %v130_v47 }
  0xd3   :  { %v247_v4 = vmul.f32 %v233_v46, %v233_v46  ;;  %v248_v51 = vmul.f32 %v130_v47, %v130_v47 }
  0xd4   :  { %270 = vxpose.xlu0.b32.start [1/3] (short) %v267_v48, 128  ;;  %v238_v52 = vmul.f32 %v237_v49, %v130_v47  ;;  %v243_v53 = vmul.f32 %v242_v50, %v233_v46  ;;  %v246_v54 = vadd.f32 %v245_v3, %v245_v3 }
  0xd5   :  { %v249_v55 = vsub.f32 %v247_v4, %v248_v51 }
  0xd6   :  { %v244_v56 = vadd.f32 %v243_v53, %v238_v52  ;;  %v258_v57 = vrot.slane %v246_v54, %v236_v37 }
  0xd7   :  { %v253_v58 = vrot.slane %v249_v55, %v236_v37 }
  0xd8   :  { %v268_v59 = vmul.f32 %v265_v13, %v244_v56  ;;  %v259_v8 = vmul.f32 %v258_v57, %v233_v46 }
  0xd9   :  { %v254_v60 = vmul.f32 %v253_v58, %v130_v47 }
  0xda   :  { %271 = vxpose.xlu0.b32.cont [2/3] (short) %v268_v59, 128 }
  0xdb   :  { %v260_v61 = vadd.f32 %v259_v8, %v254_v60 }
  0xdd   :  { %v269_v62 = vmul.f32 %v265_v13, %v260_v61 }
  0xdf   :  { %272 = vxpose.xlu0.b32.end [3/3] (short) %v269_v62, 128 }
 0x153   :  { %v286_v63 = vpop.trf.xlu0 }
 0x154   :  { %303 = vst.msk [vmem:[#allocation2] sm:$0xff] %vm302_vm0, %v286_v63 }
 0x157   :  { %v287_v0 = vpop.trf.xlu0 }
 0x158   :  { %304 = vst.msk [vmem:[#allocation2 + $0x8] sm:$0xff] %vm302_vm0, %v287_v0 }
 0x15b   :  { %v363_v1 = vld [vmem:[#allocation2] sm:$0xff]  ;;  %v288_v2 = vpop.trf.xlu0 }
 0x15c   :  { %364 = vst [vmem:[%s510_s2] sm:$0xff] %v363_v1  ;;  %305 = vst.msk [vmem:[#allocation2 + $0x10] sm:$0xff] %vm302_vm0, %v288_v2 }
 0x15f   :  { %v365_v6 = vld [vmem:[#allocation2 + $0x8] sm:$0xff]  ;;  %v289_v7 = vpop.trf.xlu0 }
 0x160   :  { %366 = vst [vmem:[%s510_s2 + $0x8] sm:$0xff] %v365_v6  ;;  %306 = vst.msk [vmem:[#allocation2 + $0x18] sm:$0xff] %vm302_vm0, %v289_v7 }
 0x163   :  { %v367_v9 = vld [vmem:[#allocation2 + $0x10] sm:$0xff]  ;;  %v290_v10 = vpop.trf.xlu0 }
 0x164   :  { %368 = vst [vmem:[%s510_s2 + $0x10] sm:$0xff] %v367_v9  ;;  %307 = vst.msk [vmem:[#allocation2 + $0x20] sm:$0xff] %vm302_vm0, %v290_v10 }
 0x167   :  { %v369_v11 = vld [vmem:[#allocation2 + $0x18] sm:$0xff]  ;;  %v291_v12 = vpop.trf.xlu0 }
 0x168   :  { %370 = vst [vmem:[%s510_s2 + $0x18] sm:$0xff] %v369_v11  ;;  %308 = vst.msk [vmem:[#allocation2 + $0x28] sm:$0xff] %vm302_vm0, %v291_v12 }
 0x16b   :  { %v371_v14 = vld [vmem:[#allocation2 + $0x20] sm:$0xff]  ;;  %v292_v15 = vpop.trf.xlu0 }
 0x16c   :  { %372 = vst [vmem:[%s510_s2 + $0x20] sm:$0xff] %v371_v14  ;;  %309 = vst.msk [vmem:[#allocation2 + $0x30] sm:$0xff] %vm302_vm0, %v292_v15 }
 0x16f   :  { %v373_v16 = vld [vmem:[#allocation2 + $0x28] sm:$0xff]  ;;  %v293_v17 = vpop.trf.xlu0 }
 0x170   :  { %374 = vst [vmem:[%s510_s2 + $0x28] sm:$0xff] %v373_v16  ;;  %310 = vst.msk [vmem:[#allocation2 + $0x38] sm:$0xff] %vm302_vm0, %v293_v17 }
 0x173   :  { %v375_v18 = vld [vmem:[#allocation2 + $0x30] sm:$0xff]  ;;  %v294_v19 = vpop.trf.xlu0 }
 0x174   :  { %376 = vst [vmem:[%s510_s2 + $0x30] sm:$0xff] %v375_v18 }
 0x177   :  { %v377_v20 = vld [vmem:[#allocation2 + $0x38] sm:$0xff]  ;;  %v295_v21 = vpop.trf.xlu0 }
 0x178   :  { %378 = vst [vmem:[%s510_s2 + $0x38] sm:$0xff] %v377_v20 }
 0x17b   :  { %v296_v22 = vpop.trf.xlu0 }
 0x17f   :  { %v297_v23 = vpop.trf.xlu0 }
 0x183   :  { %v298_v24 = vpop.trf.xlu0 }
 0x187   :  { %v299_v25 = vpop.trf.xlu0 }
 0x18b   :  { %v300_v26 = vpop.trf.xlu0 }
 0x18f   :  { %v301_v27 = vpop.trf.xlu0 }

</bundles_post_ra>
